<compile_context>
chip_gen: v7x
topology: tpu7x:2x2x1
jax: 0.10.0
libtpu: 0.0.40
codegen_flags: <defaults>
</compile_context>

<pallas_src>
import math

import jax
import jax.numpy as jnp
from jax import lax
from jax.experimental import pallas as pl
from jax.experimental.pallas import tpu as pltpu


# x:(m,k) . W:(n,k) contracted on k  ->  (m,n), i.e. x @ W.T without any HBM-side transpose.
_CONTRACT_ON_IN = (((1,), (1,)), ((), ()))

_MAX_TM = 512   # max batch tile
_MAX_TN = 512   # max Out tile


# --------------------------------------------------------------------------------------
# Kernels
# --------------------------------------------------------------------------------------
def _noisy_linear_kernel_fused(x_ref, mu_w_ref, sig_w_ref, bias_ref, eps_p_ref,
                               eps_q_ref, o_ref):
    """Single-pass body (tk == In): no accumulator, direct lane-dense writeback."""
    x = x_ref[...]                                                  # (tm, In)
    mu_dot = lax.dot_general(x, mu_w_ref[...], _CONTRACT_ON_IN,
                             preferred_element_type=jnp.float32)    # (tm, tn)
    xs = x * eps_p_ref[...]                                         # per-lane VPU scale
    sig_dot = lax.dot_general(xs, sig_w_ref[...], _CONTRACT_ON_IN,
                              preferred_element_type=jnp.float32)   # (tm, tn)
    out = mu_dot + eps_q_ref[...] * sig_dot + bias_ref[...]
    o_ref[...] = out.astype(o_ref.dtype)


def _noisy_linear_kernel_acc(x_ref, mu_w_ref, sig_w_ref, bias_ref, eps_p_ref,
                             eps_q_ref, o_ref, acc_ref):
    """K-tiled body: f32 VMEM accumulator resident across the (last) reduction axis."""
    k = pl.program_id(2)

    @pl.when(k == 0)
    def _():
        acc_ref[...] = jnp.zeros_like(acc_ref)

    x = x_ref[...]                                                  # (tm, tk)
    mu_dot = lax.dot_general(x, mu_w_ref[...], _CONTRACT_ON_IN,
                             preferred_element_type=jnp.float32)
    xs = x * eps_p_ref[...]
    sig_dot = lax.dot_general(xs, sig_w_ref[...], _CONTRACT_ON_IN,
                              preferred_element_type=jnp.float32)
    # Merged update: a single accumulator read-modify-write per k step.
    acc_ref[...] += mu_dot + eps_q_ref[...] * sig_dot

    @pl.when(k == pl.num_programs(2) - 1)
    def _():
        o_ref[...] = (acc_ref[...] + bias_ref[...]).astype(o_ref.dtype)


# --------------------------------------------------------------------------------------
# Tiling plan
# --------------------------------------------------------------------------------------
def _vmem_budget_bytes():
    """Generation-aware VMEM tiling budget (headroom below physical capacity)."""
    cap = 64 * 1024 * 1024  # conservative default: v7x physical VMEM per TensorCore
    try:
        cap = int(getattr(pltpu.get_tpu_info(), "vmem_capacity_bytes", cap))
    except Exception:
        pass
    # ~48 MiB on 64 MiB chips (v7x), capped at 96 MiB on 128 MiB chips (v5e/v6e).
    return min((cap * 3) // 4, 96 * 1024 * 1024)


def _pick_tm(B):
    """Largest divisor of B up to _MAX_TM (sublane-legal): minimizes weight re-streaming."""
    if B <= _MAX_TM:
        return B
    for d in range(_MAX_TM, 0, -1):
        if B % d == 0 and d % 8 == 0:
            return d
    return B  # pathological B: full-batch block (always legal)


def _lane_tile_candidates(dim, cap):
    """Divisors of `dim` usable as a lane-dim block (multiple of 128 or the full dim), desc."""
    cands = [d for d in range(min(dim, cap), 0, -1)
             if dim % d == 0 and (d % 128 == 0 or d == dim)]
    return cands if cands else [dim]


def _working_set_bytes(tm, tn, tk, In, xb, wb, ob, keep_k):
    ws = 2 * tm * tk * xb              # x tile, double-buffered
    ws += 2 * 2 * tn * tk * wb         # mu_W + sigma_W tiles, double-buffered
    ws += 2 * tm * tn * ob             # output tile, double-buffered
    ws += 2 * 2 * tn * 4               # fused bias + eps_q rows
    if keep_k:
        ws += tm * tn * 4              # f32 accumulator scratch
        ws += 2 * tk * 4               # eps_p row chunks
    else:
        ws += In * 4                   # grid-resident eps_p row (fetched once)
    return ws


def _apply_megacore_split(B, Out, tm, tn, tk, keep_k):
    """Ensure >=2 parallel grid steps so v7x's second TensorCore isn't idle (no-op on 1-TC)."""
    if (B // tm) * (Out // tn) < 2:
        if tn % 256 == 0:              # prefer splitting Out: total weight HBM traffic unchanged
            tn //= 2
        elif tm % 16 == 0 and tm >= 16:
            tm //= 2
    return tm, tn, tk, keep_k


def _plan_tiling(B, In, Out, xb, wb, ob, budget):
    tm = _pick_tm(B)
    # 1) Collapse the reduction axis entirely (tk = In) whenever it fits the VMEM budget.
    for tn in _lane_tile_candidates(Out, _MAX_TN):
        if _working_set_bytes(tm, tn, In, In, xb, wb, ob, keep_k=False) <= budget:
            return _apply_megacore_split(B, Out, tm, tn, In, keep_k=False)
    # 2) Keep the K reduction axis with an f32 accumulator (large In only).
    for tn in _lane_tile_candidates(Out, _MAX_TN):
        for tk in _lane_tile_candidates(In, In):
            if _working_set_bytes(tm, tn, tk, In, xb, wb, ob, keep_k=True) <= budget:
                return _apply_megacore_split(B, Out, tm, tn, tk, keep_k=True)
    # 3) Last resort: smallest lane-legal tiles.
    tn = _lane_tile_candidates(Out, _MAX_TN)[-1]
    tk = _lane_tile_candidates(In, In)[-1]
    return _apply_megacore_split(B, Out, tm, tn, tk, keep_k=True)


# --------------------------------------------------------------------------------------
# pallas_call assembly + public wrapper
# --------------------------------------------------------------------------------------
def _build_pallas_call(B, In, Out, out_dtype, tm, tn, tk, keep_k, vmem_limit_bytes,
                       flops, bytes_accessed):
    if keep_k:
        grid = (B // tm, Out // tn, In // tk)
        in_specs = [
            pl.BlockSpec((tm, tk), lambda i, j, k: (i, k)),   # x
            pl.BlockSpec((tn, tk), lambda i, j, k: (j, k)),   # mu_W   (Out, In) native layout
            pl.BlockSpec((tn, tk), lambda i, j, k: (j, k)),   # sigma_W (Out, In)
            pl.BlockSpec((1, tn), lambda i, j, k: (0, j)),    # fused bias row
            pl.BlockSpec((1, tk), lambda i, j, k: (0, k)),    # eps_p chunk
            pl.BlockSpec((1, tn), lambda i, j, k: (0, j)),    # eps_q row
        ]
        out_specs = pl.BlockSpec((tm, tn), lambda i, j, k: (i, j))
        scratch = [pltpu.VMEM((tm, tn), jnp.float32)]
        kernel = _noisy_linear_kernel_acc
        dims = ("parallel", "parallel", "arbitrary")
    else:
        grid = (B // tm, Out // tn)
        in_specs = [
            pl.BlockSpec((tm, In), lambda i, j: (i, 0)),      # x (full K resident)
            pl.BlockSpec((tn, In), lambda i, j: (j, 0)),      # mu_W
            pl.BlockSpec((tn, In), lambda i, j: (j, 0)),      # sigma_W
            pl.BlockSpec((1, tn), lambda i, j: (0, j)),       # fused bias row
            pl.BlockSpec((1, In), lambda i, j: (0, 0)),       # eps_p row (grid-resident)
            pl.BlockSpec((1, tn), lambda i, j: (0, j)),       # eps_q row
        ]
        out_specs = pl.BlockSpec((tm, tn), lambda i, j: (i, j))
        scratch = []
        kernel = _noisy_linear_kernel_fused
        dims = ("parallel", "parallel")

    grid_spec = pltpu.PrefetchScalarGridSpec(
        num_scalar_prefetch=0,
        grid=grid,
        in_specs=in_specs,
        out_specs=out_specs,
        scratch_shapes=scratch,
    )
    return pl.pallas_call(
        kernel,
        out_shape=jax.ShapeDtypeStruct((B, Out), out_dtype),
        grid_spec=grid_spec,
        compiler_params=pltpu.CompilerParams(
            dimension_semantics=dims,
            vmem_limit_bytes=vmem_limit_bytes,
        ),
        cost_estimate=pl.CostEstimate(flops=flops, transcendentals=0,
                                      bytes_accessed=bytes_accessed),
    )


def noisy_linear_forward(x, mu_W, sigma_W, mu_bias, sigma_bias, eps_p, eps_q,
                         *, training=True, force_pallas=False, vmem_budget_bytes=None):
    """NoisyLinear forward. x: (B, In) -> (B, Out). Works for f32 or bf16 parameters."""
    B, In = x.shape
    Out, In_w = mu_W.shape
    assert In_w == In

    if not training:
        # TODO(synk): a dedicated eval kernel (mu_W / mu_bias only) would skip the sigma_W
        # HBM stream entirely; eval currently reuses the noisy kernel with eps == 0, which
        # is numerically identical to F.linear(x, mu_W, mu_bias).
        eps_p = jnp.zeros_like(eps_p)
        eps_q = jnp.zeros_like(eps_q)

    # Sub-128 layers: fixed pallas_call/grid overhead + masked partial output stores dominate,
    # plain XLA is faster (perf-review item). force_pallas=True overrides for testing.
    if not force_pallas and max(In, Out) < 128 and B <= 256:
        weight = mu_W + sigma_W * jnp.outer(eps_q, eps_p)
        bias = mu_bias + sigma_bias * eps_q
        return (x @ weight.T + bias).astype(x.dtype)

    hw_budget = _vmem_budget_bytes()
    plan_budget = min(vmem_budget_bytes, hw_budget) if vmem_budget_bytes else hw_budget

    xb = x.dtype.itemsize
    wb = mu_W.dtype.itemsize
    ob = x.dtype.itemsize
    tm, tn, tk, keep_k = _plan_tiling(B, In, Out, xb, wb, ob, plan_budget)

    # Tiny O(Out)/O(In) wrapper-side prep: fused bias (drops two input streams) and
    # row-shaped noise vectors. No weight-matrix transposes or full-tensor rescaling here.
    bias_row = (mu_bias + sigma_bias * eps_q).reshape(1, Out)
    eps_p_row = eps_p.reshape(1, In)
    eps_q_row = eps_q.reshape(1, Out)

    n_batch_tiles = B // tm
    flops = 4 * B * In * Out  # two MXU matmuls
    bytes_accessed = (B * In * xb + B * Out * ob
                      + n_batch_tiles * 2 * Out * In * wb)

    call = _build_pallas_call(B, In, Out, x.dtype, tm, tn, tk, keep_k,
                              vmem_limit_bytes=hw_budget,
                              flops=flops, bytes_accessed=bytes_accessed)
    return call(x, mu_W, sigma_W, bias_row, eps_p_row, eps_q_row)


# --------------------------------------------------------------------------------------
# Demo / correctness checks
# --------------------------------------------------------------------------------------
def _factorized_noise(key, n, dtype=jnp.float32):
    """NoisyLinear.f: x ~ N(0,1), f(x) = sign(x) * sqrt(|x|)."""
    x = jax.random.normal(key, (n,), dtype=dtype)
    return jnp.sign(x) * jnp.sqrt(jnp.abs(x))


def _make_params(key, in_features, out_features, noisy_std=0.5, dtype=jnp.float32):
    """Mirror NoisyLinear.reset() + sample()."""
    k_muw, k_mub, k_ep, k_eq, k_x = jax.random.split(key, 5)
    bound = 1.0 / math.sqrt(in_features)
    mu_W = jax.random.uniform(k_muw, (out_features, in_features),
                              minval=-bound, maxval=bound, dtype=dtype)
    mu_bias = jax.random.uniform(k_mub, (out_features,),
                                 minval=-bound, maxval=bound, dtype=dtype)
    sigma_W = jnp.full((out_features, in_features),
                       noisy_std / math.sqrt(in_features), dtype)
    sigma_bias = jnp.full((out_features,), noisy_std / math.sqrt(in_features), dtype)
    eps_p = _factorized_noise(k_ep, in_features, dtype)
    eps_q = _factorized_noise(k_eq, out_features, dtype)
    return mu_W, sigma_W, mu_bias, sigma_bias, eps_p, eps_q, k_x


def _reference(x, mu_W, sigma_W, mu_bias, sigma_bias, eps_p, eps_q, training=True):
    if training:
        weight = mu_W + sigma_W * jnp.outer(eps_q, eps_p)
        bias = mu_bias + sigma_bias * eps_q
    else:
        weight, bias = mu_W, mu_bias
    return x @ weight.T + bias


def _run_case(case_idx, batch, in_features, out_features, **kwargs):
    key = jax.random.fold_in(jax.random.PRNGKey(0), case_idx)
    mu_W, sigma_W, mu_bias, sigma_bias, eps_p, eps_q, k_x = _make_params(
        key, in_features, out_features)
    x = jax.random.normal(k_x, (batch, in_features), dtype=jnp.float32)

    y = noisy_linear_forward(x, mu_W, sigma_W, mu_bias, sigma_bias, eps_p, eps_q, **kwargs)
    y = jax.block_until_ready(y)

    y_ref = _reference(x, mu_W, sigma_W, mu_bias, sigma_bias, eps_p, eps_q,
                       training=kwargs.get("training", True))
    assert y.shape == (batch, out_features)
    assert jnp.allclose(y, y_ref, atol=1e-4, rtol=1e-4), (
        f"case {case_idx}: max abs err {float(jnp.max(jnp.abs(y - y_ref)))}")


if __name__ == "__main__":
    # 1) Lane-dense small layer: single-pass (tk = In) Pallas path, grid split for 2 TCs.
    _run_case(0, batch=64, in_features=128, out_features=128)
    # 2) Sub-128 layer forced through the Pallas path (default dispatch would use plain XLA).
    _run_case(1, batch=8, in_features=32, out_features=32, force_pallas=True)
    # 3) Non-power-of-two batch + mixed Out: exercises divisor-based tile picking.
    _run_case(2, batch=96, in_features=256, out_features=384)
    # 4) Artificially small VMEM budget: exercises the K-tiled accumulator fallback kernel.
    _run_case(3, batch=64, in_features=512, out_features=256, vmem_budget_bytes=1_000_000)
    # 5) Eval mode (weight = mu_W, bias = mu_bias).
    _run_case(4, batch=64, in_features=128, out_features=128, training=False)
    print("KERNEL_OK")
</pallas_src>

<mosaic_0001>
module attributes {stable_mosaic.version = 11 : i64} {
  func.func @_noisy_linear_kernel_fused(%arg0: i32, %arg1: i32, %arg2: memref<32x128xf32, #tpu.memory_space<vmem>>, %arg3: memref<128x128xf32, #tpu.memory_space<vmem>>, %arg4: memref<128x128xf32, #tpu.memory_space<vmem>>, %arg5: memref<1x128xf32, #tpu.memory_space<vmem>>, %arg6: memref<1x128xf32, #tpu.memory_space<vmem>>, %arg7: memref<1x128xf32, #tpu.memory_space<vmem>>, %arg8: memref<32x128xf32, #tpu.memory_space<vmem>>) attributes {dimension_semantics = [#tpu.dimension_semantics<parallel>, #tpu.dimension_semantics<parallel>], iteration_bounds = array<i64: 2, 1>, scalar_prefetch = 0 : i64, scratch_operands = 0 : i64, tpu.core_type = #tpu.core_type<tc>, window_params = [{transform_indices = @transform_0, window_bounds = array<i64: 32, 128>}, {transform_indices = @transform_1, window_bounds = array<i64: 128, 128>}, {transform_indices = @transform_2, window_bounds = array<i64: 128, 128>}, {transform_indices = @transform_3, window_bounds = array<i64: 1, 128>}, {pipeline_mode = #tpu.pipeline_mode<synchronous>, transform_indices = @transform_4, window_bounds = array<i64: 1, 128>}, {transform_indices = @transform_5, window_bounds = array<i64: 1, 128>}, {transform_indices = @transform_6, window_bounds = array<i64: 32, 128>}]} {
    %c0 = arith.constant 0 : index
    %c0_0 = arith.constant 0 : index
    %0 = vector.load %arg2[%c0, %c0_0] : memref<32x128xf32, #tpu.memory_space<vmem>>, vector<32x128xf32>
    %c0_1 = arith.constant 0 : index
    %c0_2 = arith.constant 0 : index
    %1 = vector.load %arg3[%c0_1, %c0_2] : memref<128x128xf32, #tpu.memory_space<vmem>>, vector<128x128xf32>
    %cst = arith.constant dense<0.000000e+00> : vector<32x128xf32>
    %2 = tpu.matmul %0, %1, %cst {dimension_numbers = #tpu.dot_dimension_numbers<[1], [1], [0], [0], [0, 0, 1, 0], [], []>} : vector<32x128xf32>, vector<128x128xf32>, vector<32x128xf32> -> vector<32x128xf32>
    %c0_3 = arith.constant 0 : index
    %c0_4 = arith.constant 0 : index
    %3 = vector.load %arg6[%c0_3, %c0_4] : memref<1x128xf32, #tpu.memory_space<vmem>>, vector<1x128xf32>
    %4 = vector.broadcast %3 : vector<1x128xf32> to vector<32x128xf32>
    %5 = arith.mulf %0, %4 : vector<32x128xf32>
    %c0_5 = arith.constant 0 : index
    %c0_6 = arith.constant 0 : index
    %6 = vector.load %arg4[%c0_5, %c0_6] : memref<128x128xf32, #tpu.memory_space<vmem>>, vector<128x128xf32>
    %cst_7 = arith.constant dense<0.000000e+00> : vector<32x128xf32>
    %7 = tpu.matmul %5, %6, %cst_7 {dimension_numbers = #tpu.dot_dimension_numbers<[1], [1], [0], [0], [0, 0, 1, 0], [], []>} : vector<32x128xf32>, vector<128x128xf32>, vector<32x128xf32> -> vector<32x128xf32>
    %c0_8 = arith.constant 0 : index
    %c0_9 = arith.constant 0 : index
    %8 = vector.load %arg7[%c0_8, %c0_9] : memref<1x128xf32, #tpu.memory_space<vmem>>, vector<1x128xf32>
    %9 = vector.broadcast %8 : vector<1x128xf32> to vector<32x128xf32>
    %10 = arith.mulf %9, %7 : vector<32x128xf32>
    %11 = arith.addf %2, %10 : vector<32x128xf32>
    %c0_10 = arith.constant 0 : index
    %c0_11 = arith.constant 0 : index
    %12 = vector.load %arg5[%c0_10, %c0_11] : memref<1x128xf32, #tpu.memory_space<vmem>>, vector<1x128xf32>
    %13 = vector.broadcast %12 : vector<1x128xf32> to vector<32x128xf32>
    %14 = arith.addf %11, %13 : vector<32x128xf32>
    %c0_12 = arith.constant 0 : index
    %c0_13 = arith.constant 0 : index
    %15 = vector.load %arg8[%c0_12, %c0_13] : memref<32x128xf32, #tpu.memory_space<vmem>>, vector<32x128xf32>
    tpu.vector_store %arg8[%c0_12, %c0_13], %14 {strides = array<i32>} : memref<32x128xf32, #tpu.memory_space<vmem>>, vector<32x128xf32>,
    return
  }
  func.func @transform_0(%arg0: i32, %arg1: i32) -> (i32, i32) {
    %c0_i32 = arith.constant 0 : i32
    %c0_i32_0 = arith.constant 0 : i32
    return %arg0, %c0_i32 : i32, i32
  }
  func.func @transform_1(%arg0: i32, %arg1: i32) -> (i32, i32) {
    %c0_i32 = arith.constant 0 : i32
    %c0_i32_0 = arith.constant 0 : i32
    return %arg1, %c0_i32 : i32, i32
  }
  func.func @transform_2(%arg0: i32, %arg1: i32) -> (i32, i32) {
    %c0_i32 = arith.constant 0 : i32
    %c0_i32_0 = arith.constant 0 : i32
    return %arg1, %c0_i32 : i32, i32
  }
  func.func @transform_3(%arg0: i32, %arg1: i32) -> (i32, i32) {
    %c0_i32 = arith.constant 0 : i32
    %c0_i32_0 = arith.constant 0 : i32
    return %c0_i32, %arg1 : i32, i32
  }
  func.func @transform_4(%arg0: i32, %arg1: i32) -> (i32, i32) {
    %c0_i32 = arith.constant 0 : i32
    %c0_i32_0 = arith.constant 0 : i32
    %c0_i32_1 = arith.constant 0 : i32
    return %c0_i32, %c0_i32_0 : i32, i32
  }
  func.func @transform_5(%arg0: i32, %arg1: i32) -> (i32, i32) {
    %c0_i32 = arith.constant 0 : i32
    %c0_i32_0 = arith.constant 0 : i32
    return %c0_i32, %arg1 : i32, i32
  }
  func.func @transform_6(%arg0: i32, %arg1: i32) -> (i32, i32) {
    %c0_i32 = arith.constant 0 : i32
    return %arg0, %arg1 : i32, i32
  }
}

</mosaic_0001>

<bundles_post_ra>
// kernel: tpu_custom_call.1
= control target key start
LH: loop header
LB: loop body
LE: loop exit
PB: predicated region body
PF: predicated region fallthrough
CT: control target
= control target key end

     0   :  { %11 = vsyncpa [#allocation3], 0  ;;  %s1548_s0 = inlined_call_operand.hbm [shape: f32[64,128], index: 0, kind: input, shape index: {}]   ;;  %s1549_s1 = inlined_call_operand.hbm [shape: f32[128,128], index: 1, kind: input, shape index: {}]   ;;  %s1550_s2 = inlined_call_operand.hbm [shape: f32[128,128], index: 2, kind: input, shape index: {}]   ;;  %s1551_s3 = inlined_call_operand.vmem [shape: f32[1,128], index: 3, kind: input, shape index: {}]   ;;  %s1552_s4 = inlined_call_operand.vmem [shape: f32[1,128], index: 4, kind: input, shape index: {}]   ;;  %s1553_s5 = inlined_call_operand.vmem [shape: f32[1,128], index: 5, kind: input, shape index: {}]   ;;  %s1554_s6 = inlined_call_operand.hbm [shape: f32[64,128], index: 6, kind: output, shape index: {}]  }
   0x1   :  { %13 = vsyncpa [#allocation3 + $0x1], 0 }
   0x2   :  { %14 = vsyncpa [#allocation6], 0 }
   0x3   :  { %15 = vsyncpa [#allocation4], 0 }
   0x4   :  { %17 = vsyncpa [#allocation4 + $0x1], 0  ;;  %s1259_s21 = smov 0   ;;  %s1261_s22 = smov 0  }
   0x5   :  { %s1263_s23 = smov 0   ;;  %s1265_s24 = smov 0  }
   0x6   :  { %s1267_s25 = smov 0   ;;  %s1269_s26 = smov 0  }
   0x7 LB: > { %s749_s27 = sadd.s32 4294967295, %s1214_s26   ;;  %s750_s28 = sadd.s32 4294967294, %s1214_s26   ;;  %s1214_s26 = sphi %s1269_s26, %s23_s26   ;;  %s1210_s25 = sphi %s1267_s25, %s1581_s25   ;;  %s1206_s24 = sphi %s1265_s24, %s1580_s24   ;;  %s1202_s23 = sphi %s1263_s23, %s1579_s23   ;;  %s1198_s22 = sphi %s1261_s22, %s1578_s22   ;;  %s1194_s21 = sphi %s1259_s21, %s1577_s21  }
   0x8   : > { %p55_p0 = scmp.ne.s32.totalorder %s1198_s22, %s1194_s21  ;;  %p1293_p1 = scmp.eq.s32.totalorder %s749_s27, 0 }
   0x9   : > { %p1297_p2 = scmp.eq.s32.totalorder %s749_s27, 1  ;;  %p212_p3 = scmp.eq.s32.totalorder %s750_s28, 1 }
   0xa   : > { %s1561_s29 = scalar_select %p1293_p1, 1, 0 }
   0xb   : > { %p1303_p4 = por %p1293_p1, %p55_p0  ;;  %p751_p5 = scmp.ge.s32.totalorder %s1214_s26, 1 }
   0xc   : > { %p1308_p6 = por %p212_p3, %p55_p0  ;;  %p219_p7 = scmp.lt.s32.totalorder %s1214_s26, 3 }
   0xd   : > { %s1563_s7 = scalar_select %p1303_p4, 1, 0 }
   0xe   : > { %s1564_s8 = scalar_select %p1308_p6, 1, 0 }
   0xf   : > { %p1313_p8 = pnand %p751_p5, %p219_p7  ;;  %s1216_s10 = smov [#allocation5]  }
  0x10   : > { %1565 = sst [smem:[#allocation12_spill]] %s1564_s8  ;;  %s234_s11 = sshll.u32 %s1216_s10, 4  ;;  %s1317_s11 = int_to_ptr.vmem [resolvable:$true] %s234_s11 }
  0x11   : > { %p967_p9 = pneg %p1313_p8  ;;  %s1217_s13 = smov [#allocation7]  }
  0x12   : > { %s250_s14 = sshll.u32 %s1217_s13, 4  ;;  %s1042_s17 = scalar_lea.hbm %s1549_s1, 2048  ;;  %s1328_s14 = int_to_ptr.vmem [resolvable:$true] %s250_s14 }
  0x13   : > { %p1324_p11 = pnand %p967_p9, %p1293_p1  ;;  %p1043_p12 = scmp.ne.s32.totalorder %s1549_s1, %s1042_s17 }
  0x14   : > { %p1049_p5 = scmp.lt.u32.totalorder %s1042_s17, %s1549_s1 }
  0x15   : > { %p1044_p13 = pneg %p1324_p11 }
  0x17   : > { %p1045_p0 = pnand %p1044_p13, %p1043_p12 }
  0x19   : > { %p1046_p3 = pneg %p1045_p0 }
  0x1b   : > { %p1051_p7 = pnand %p1049_p5, %p1046_p3 }
  0x1d   : > { %1054 = shalt.err (!%p1051_p7)
}
  0x1e   : > { %s1055_s28 = scalar_lea.vmem %s1317_s11, 2048  ;;  %p1063_p1 = scmp.lt.s32.totalorder %s1317_s11, %s1317_s11 }
  0x1f   : > { %p1056_p9 = scmp.ne.s32.totalorder %s1317_s11, %s1055_s28  ;;  %p1064_p12 = scmp.lt.s32.totalorder %s1055_s28, %s1055_s28 }
  0x21   : > { %p1058_p10 = pnand %p1056_p9, %p1044_p13  ;;  %p1065_p0 = por %p1064_p12, %p1063_p1 }
  0x23   : > { %p1059_p6 = pneg %p1058_p10 }
  0x25   : > { %p1066_p4 = pnand %p1065_p0, %p1059_p6 }
  0x27   : > { %1069 = shalt.err (!%p1066_p4)
}
  0x28   : > { %s1559_s10 = smov 128   ;;  %s1219_s13 = smov 8  }
  0x29   : > { %970 = dma.hbm_to_vmem [thread:$0]  (!%p1324_p11), %s1549_s1, 2048, %s1317_s11, [#allocation6], %s1559_s10, %s1559_s10, %s1219_s13  }
  0x2a   : > { %s1070_s19 = scalar_lea.hbm %s1550_s2, 2048 }
  0x2b   : > { %p1071_p1 = scmp.ne.s32.totalorder %s1550_s2, %s1070_s19  ;;  %p1077_p10 = scmp.lt.u32.totalorder %s1070_s19, %s1550_s2 }
  0x2d   : > { %p1073_p4 = pnand %p1071_p1, %p1044_p13 }
  0x2f   : > { %p1074_p6 = pneg %p1073_p4 }
  0x31   : > { %p1079_p3 = pnand %p1077_p10, %p1074_p6 }
  0x33   : > { %1082 = shalt.err (!%p1079_p3)
}
  0x34   : > { %s1083_s11 = scalar_lea.vmem %s1328_s14, 2048  ;;  %p1091_p12 = scmp.lt.s32.totalorder %s1328_s14, %s1328_s14 }
  0x35   : > { %p1084_p5 = scmp.ne.s32.totalorder %s1328_s14, %s1083_s11  ;;  %p1092_p0 = scmp.lt.s32.totalorder %s1083_s11, %s1083_s11 }
  0x37   : > { %p1086_p7 = pnand %p1084_p5, %p1044_p13  ;;  %p1093_p1 = por %p1092_p0, %p1091_p12 }
  0x39   : > { %p1087_p9 = pneg %p1086_p7 }
  0x3b   : > { %p1094_p4 = pnand %p1093_p1, %p1087_p9 }
  0x3d   : > { %1097 = shalt.err (!%p1094_p4)
}
  0x3e   : > { %973 = dma.hbm_to_vmem [thread:$0]  (!%p1324_p11), %s1550_s2, 2048, %s1328_s14, [#allocation6], %s1559_s10, %s1559_s10, %s1219_s13  }
  0x3f   : > { %s35_s12 = sadd.s32 1, %s1210_s25  ;;  %s42_s16 = sadd.s32 1, %s1202_s23 }
  0x40   : > { %p37_p13 = scmp.ge.s32.totalorder %s35_s12, 2  ;;  %p49_p6 = scmp.ne.s32.totalorder %s1202_s23, %s1198_s22 }
  0x41   : > { %p50_p10 = scmp.eq.s32.totalorder %s1214_s26, 0  ;;  %p984_p3 = scmp.lt.s32.totalorder %s1214_s26, 2 }
  0x42   : > { %s1583_s12 = smov (%p37_p13, %s35_s12), 0  ;;  %p1398_p7 = por %p1297_p2, %p49_p6 }
  0x43   : > { %p51_p5 = por %p50_p10, %p49_p6  ;;  %s39_s18 = ssub.s32 %s1210_s25, %s1583_s12 }
  0x44   : > { %s1568_s17 = scalar_select %p1398_p7, 1, 0 }
  0x45   : > { %s279_s19 = sand.u32 1, %s1202_s23   ;;  %p40_p9 = scmp.eq.s32.totalorder %s39_s18, 0 }
  0x46   : > { %s757_s14 = sshll.u32 %s279_s19, 5  ;;  %s773_s20 = sshll.u32 %s1210_s25, 9 }
  0x47   : > { %s1407_s27 = scalar_select %p40_p9, %s1202_s23, %s42_s16  }
  0x48   : > { %s1412_s8 = scalar_lea.hbm %s1548_s0, %s773_s20  ;;  %s283_s30 = scalar_lea.vmem [#allocation2], %s757_s14 }
  0x49   : > { %s290_s15 = sshll.u32 %s283_s30, 4  ;;  %p1416_p2 = pnand %p984_p3, %p51_p5  ;;  %s1420_s15 = int_to_ptr.vmem [resolvable:$true] %s290_s15 }
  0x4a   : > { %s1422_s16 = scalar_lea.sflag [#allocation3], %s279_s19  ;;  %s1098_s18 = scalar_lea.hbm %s1412_s8, 512 }
  0x4b   : > { %p1099_p11 = scmp.ne.s32.totalorder %s1412_s8, %s1098_s18  ;;  %p1100_p12 = pneg %p1416_p2 }
  0x4c   : > { %s1103_s28 = scalar_lea.hbm %s1548_s0, 1024  ;;  %p1104_p4 = scmp.lt.u32.totalorder %s1412_s8, %s1548_s0 }
  0x4d   : > { %p1101_p0 = pnand %p1100_p12, %p1099_p11  ;;  %p1105_p13 = scmp.lt.u32.totalorder %s1103_s28, %s1098_s18 }
  0x4e   : > { %p1107_p10 = scmp.lt.u32.totalorder %s1098_s18, %s1412_s8 }
  0x4f   : > { %p1102_p1 = pneg %p1101_p0  ;;  %p1106_p6 = por %p1105_p13, %p1104_p4 }
  0x51   : > { %p1108_p3 = por %p1107_p10, %p1106_p6 }
  0x53   : > { %p1109_p5 = pnand %p1108_p3, %p1102_p1 }
  0x55   : > { %1112 = shalt.err (!%p1109_p5)
}
  0x56   : > { %s1113_s19 = scalar_lea.vmem %s1420_s15, 512  ;;  %s1220_s14 = smov [#allocation2]  }
  0x57   : > { %p1114_p9 = scmp.ne.s32.totalorder %s1420_s15, %s1113_s19  ;;  %s1118_s20 = sshll.u32 %s1220_s14, 4  ;;  %s1119_s20 = int_to_ptr.vmem [resolvable:$false] %s1118_s20 }
  0x58   : > { %s1120_s11 = scalar_lea.vmem %s1119_s20, 1024  ;;  %p1121_p7 = scmp.lt.s32.totalorder %s1420_s15, %s1119_s20 }
  0x59   : > { %p1116_p11 = pnand %p1114_p9, %p1100_p12  ;;  %p1122_p4 = scmp.lt.s32.totalorder %s1120_s11, %s1113_s19 }
  0x5b   : > { %p1117_p0 = pneg %p1116_p11  ;;  %p1123_p13 = por %p1122_p4, %p1121_p7 }
  0x5d   : > { %p1124_p6 = pnand %p1123_p13, %p1117_p0 }
  0x5f   : > { %1127 = shalt.err (!%p1124_p6)
}
  0x60   : > { %s1570_s18 = smov 128   ;;  %302 = sbr.rel (%p1313_p8) target bundleno = 412 (0x19c), region = 44 }
  0x61   : > { %977 = dma.hbm_to_vmem [thread:$0]  (!%p1416_p2), %s1412_s8, 512, %s1420_s15, %s1422_s16, %s1570_s18, %s1570_s18, %s1219_s13  }
  0x62   : > { %s1456_s28 = sand.u32 (!%p1313_p8), 1, %s1198_s22   ;;  %p1571_p7 = scmp.ne.s32.totalorder (!%p1313_p8), %s1563_s7, 0 }
  0x63   : > { %s761_s30 = sshll.u32 (!%p1313_p8), %s1456_s28, 5  ;;  %s305_s19 = scalar_lea.sflag (!%p1313_p8), [#allocation3], %s1456_s28 }
  0x64   : > { %s1462_s10 = scalar_lea.vmem (!%p1313_p8), [#allocation2], %s761_s30 }
  0x67   : > { %1181 = dma.done.wait (%p1571_p7), %s305_s19, 512  }
  0x68   : > { %1183 = vsyncadd (%p1571_p7), %s305_s19, 4294966784  ;;  %p1572_p2 = scmp.ne.s32.totalorder %s1561_s29, 0 }
  0x6a   : > { %1185 = dma.done.wait (%p1572_p2), [#allocation6], 4096  }
  0x6b   : > { %1187 = vsyncadd (%p1572_p2), [#allocation6], 4294963200  ;;  %v392_v0 = vld [vmem:[#allocation7] sm:$0xff]  ;;  %v393_v1 = vld [vmem:[#allocation7 + $0x8] sm:$0xff]  ;;  %s350_s16 = scalar_lea.vmem [#allocation8], %s761_s30  ;;  %s774_s20 = sshll.u32 %s1206_s24, 9 }
  0x6c   : > { %v365_v2 = vld [vmem:[#allocation5] sm:$0xff]  ;;  %v891_v3 = vpack.c.bf16 %v393_v1, %v392_v0  ;;  %v366_v4 = vld [vmem:[#allocation5 + $0x8] sm:$0xff]  ;;  %v394_v5 = vld [vmem:[#allocation7 + $0x10] sm:$0xff]  ;;  %s619_s14 = sshll.u32 %s350_s16, 4  ;;  %s1499_s30 = scalar_lea.hbm %s1554_s6, %s774_s20  ;;  %s1494_s14 = int_to_ptr.vmem [resolvable:$true] %s619_s14 }
  0x6d   : > { %v395_v6 = vld [vmem:[#allocation7 + $0x18] sm:$0xff]  ;;  %v923_v7 = vpack.c.bf16 %v366_v4, %v365_v2  ;;  %v367_v9 = vld [vmem:[#allocation5 + $0x10] sm:$0xff]  ;;  %v396_v12 = vld [vmem:[#allocation7 + $0x20] sm:$0xff]  ;;  %s605_s19 = scalar_lea.sflag [#allocation4], %s1456_s28  ;;  %s1128_s24 = scalar_lea.vmem %s1494_s14, 512 }
  0x6e   : > { %v895_v8 = vpack.c.bf16 %v395_v6, %v394_v5  ;;  %v368_v10 = vld [vmem:[#allocation5 + $0x18] sm:$0xff]  ;;  %892 = vmatprep.subr.bf16.mxu0 %v891_v3  ;;  %v397_v13 = vld [vmem:[#allocation7 + $0x28] sm:$0xff]  ;;  %v369_v14 = vld [vmem:[#allocation5 + $0x20] sm:$0xff]  ;;  %p1129_p8 = scmp.ne.s32.totalorder %s1494_s14, %s1128_s24  ;;  %p1573_p12 = scmp.ne.s32.totalorder %s1568_s17, 0 }
  0x6f   : > { %v927_v11 = vpack.c.bf16 %v368_v10, %v367_v9  ;;  %894 = vmatpush3.bf16.xpose.msra.mxu0 %v891_v3  ;;  %924 = vmatprep.subr.bf16.mxu1 %v923_v7  ;;  %v370_v15 = vld [vmem:[#allocation5 + $0x28] sm:$0xff]  ;;  %v899_v16 = vpack.c.bf16 %v397_v13, %v396_v12  ;;  %v361_v18 = vld [vmem:[%s1462_s10] sm:$0xff]  ;;  %v398_v21 = vld [vmem:[#allocation7 + $0x30] sm:$0xff] }
  0x70   : > { %926 = vmatpush3.bf16.xpose.msra.mxu1 %v923_v7  ;;  %896 = vmatprep.subr.bf16.mxu0 %v895_v8  ;;  %v931_v17 = vpack.c.bf16 %v370_v15, %v369_v14  ;;  %v1476_v19 = vld [vmem:[%s1552_s4] ss:$0 sm:$0xff]  ;;  %v399_v22 = vld [vmem:[#allocation7 + $0x38] sm:$0xff]  ;;  %v371_v23 = vld [vmem:[#allocation5 + $0x30] sm:$0xff]  ;;  %p1130_p1 = pnand %p1129_p8, %p1573_p12 }
  0x71   : > { %928 = vmatprep.subr.bf16.mxu1 %v927_v11  ;;  %885 = vmatprep.mubr.f32.mxu1 %v361_v18  ;;  %v388_v20 = vmul.f32 %v1476_v19, %v361_v18  ;;  %v372_v24 = vld [vmem:[#allocation5 + $0x38] sm:$0xff]  ;;  %v903_v25 = vpack.c.bf16 %v399_v22, %v398_v21  ;;  %v400_v27 = vld [vmem:[#allocation7 + $0x40] sm:$0xff]  ;;  %v401_v28 = vld [vmem:[#allocation7 + $0x48] sm:$0xff] }
  0x72   : > { %v935_v26 = vpack.c.bf16 %v372_v24, %v371_v23  ;;  %v373_v29 = vld [vmem:[#allocation5 + $0x40] sm:$0xff]  ;;  %v374_v30 = vld [vmem:[#allocation5 + $0x48] sm:$0xff]  ;;  %v907_v31 = vpack.c.bf16 %v401_v28, %v400_v27  ;;  %v402_v33 = vld [vmem:[#allocation7 + $0x50] sm:$0xff]  ;;  %p1131_p10 = pneg %p1130_p1 }
  0x73   : > { %847 = vmatprep.mubr.f32.mxu0 %v388_v20  ;;  %v939_v32 = vpack.c.bf16 %v374_v30, %v373_v29  ;;  %v403_v34 = vld [vmem:[#allocation7 + $0x58] sm:$0xff]  ;;  %v375_v35 = vld [vmem:[#allocation5 + $0x50] sm:$0xff]  ;;  %v404_v39 = vld [vmem:[#allocation7 + $0x60] sm:$0xff] }
  0x74   : > { %v376_v36 = vld [vmem:[#allocation5 + $0x58] sm:$0xff]  ;;  %v911_v37 = vpack.c.bf16 %v403_v34, %v402_v33  ;;  %v405_v40 = vld [vmem:[#allocation7 + $0x68] sm:$0xff]  ;;  %v377_v41 = vld [vmem:[#allocation5 + $0x60] sm:$0xff] }
  0x75   : > { %v943_v38 = vpack.c.bf16 %v376_v36, %v375_v35  ;;  %v378_v42 = vld [vmem:[#allocation5 + $0x68] sm:$0xff]  ;;  %v915_v43 = vpack.c.bf16 %v405_v40, %v404_v39  ;;  %v406_v45 = vld [vmem:[#allocation7 + $0x70] sm:$0xff]  ;;  %v407_v46 = vld [vmem:[#allocation7 + $0x78] sm:$0xff] }
  0x76   : > { %v947_v44 = vpack.c.bf16 %v378_v42, %v377_v41  ;;  %v379_v47 = vld [vmem:[#allocation5 + $0x70] sm:$0xff]  ;;  %v380_v48 = vld [vmem:[#allocation5 + $0x78] sm:$0xff]  ;;  %v919_v49 = vpack.c.bf16 %v407_v46, %v406_v45  ;;  %v362_v51 = vld [vmem:[%s1462_s10 + $0x8] sm:$0xff] }
  0x77   : > { %898 = vmatpush3.bf16.xpose.msra.mxu0 %v895_v8  ;;  %v951_v50 = vpack.c.bf16 %v380_v48, %v379_v47  ;;  %v363_v52 = vld [vmem:[%s1462_s10 + $0x10] sm:$0xff]  ;;  %v389_v53 = vmul.f32 %v1476_v19, %v362_v51  ;;  %v364_v55 = vld [vmem:[%s1462_s10 + $0x18] sm:$0xff]  ;;  %v766_v57 = vld [vmem:[%s1553_s5] ss:$0 sm:$0xff]  ;;  %s1221_s10 = smov [#allocation8]  }
  0x78   : > { %930 = vmatpush3.bf16.xpose.msra.mxu1 %v927_v11  ;;  %900 = vmatprep.subr.bf16.mxu0 %v899_v16  ;;  %v390_v54 = vmul.f32 %v1476_v19, %v363_v52  ;;  %v391_v56 = vmul.f32 %v1476_v19, %v364_v55  ;;  %v767_v63 = vld [vmem:[%s1551_s3] ss:$0 sm:$0xff]  ;;  %s1132_s29 = sshll.u32 %s1221_s10, 4  ;;  %s1133_s29 = int_to_ptr.vmem [resolvable:$false] %s1132_s29 }
  0x79   : > { %932 = vmatprep.subr.bf16.mxu1 %v931_v17  ;;  %s1134_s7 = scalar_lea.vmem %s1133_s29, 1024  ;;  %p1135_p3 = scmp.lt.s32.totalorder %s1494_s14, %s1133_s29 }
  0x7a   : > { %p1136_p5 = scmp.lt.s32.totalorder %s1134_s7, %s1128_s24 }
  0x7c   : > { %p1137_p9 = por %p1136_p5, %p1135_p3 }
  0x7e   : > { %p1138_p11 = pnand %p1137_p9, %p1131_p10 }
  0x7f   : > { %902 = vmatpush3.bf16.xpose.msra.mxu0 %v899_v16 }
  0x80   : > { %934 = vmatpush3.bf16.xpose.msra.mxu1 %v931_v17  ;;  %904 = vmatprep.subr.bf16.mxu0 %v903_v25 }
  0x81   : > { %936 = vmatprep.subr.bf16.mxu1 %v935_v26 }
  0x87   : > { %906 = vmatpush3.bf16.xpose.msra.mxu0 %v903_v25 }
  0x88   : > { %938 = vmatpush3.bf16.xpose.msra.mxu1 %v935_v26  ;;  %908 = vmatprep.subr.bf16.mxu0 %v907_v31 }
  0x89   : > { %940 = vmatprep.subr.bf16.mxu1 %v939_v32 }
  0x8f   : > { %910 = vmatpush3.bf16.xpose.msra.mxu0 %v907_v31 }
  0x90   : > { %942 = vmatpush3.bf16.xpose.msra.mxu1 %v939_v32  ;;  %912 = vmatprep.subr.bf16.mxu0 %v911_v37 }
  0x91   : > { %944 = vmatprep.subr.bf16.mxu1 %v943_v38 }
  0x97   : > { %914 = vmatpush3.bf16.xpose.msra.mxu0 %v911_v37 }
  0x98   : > { %946 = vmatpush3.bf16.xpose.msra.mxu1 %v943_v38  ;;  %916 = vmatprep.subr.bf16.mxu0 %v915_v43 }
  0x99   : > { %948 = vmatprep.subr.bf16.mxu1 %v947_v44 }
  0x9f   : > { %918 = vmatpush3.bf16.xpose.msra.mxu0 %v915_v43 }
  0xa0   : > { %950 = vmatpush3.bf16.xpose.msra.mxu1 %v947_v44  ;;  %920 = vmatprep.subr.bf16.mxu0 %v919_v49 }
  0xa1   : > { %952 = vmatprep.subr.bf16.mxu1 %v951_v50 }
  0xa7   : > { %922 = vmatpush3.bf16.xpose.msra.mxu0 %v919_v49 }
  0xa8   : > { %954 = vmatpush3.bf16.xpose.msra.mxu1 %v951_v50 }
  0xae   : > { %848 = vmatmul.mubr.f32.vlgmr.msra.gmra.mrb[0].mxu0 %v389_v53 }
  0xaf   : > { %886 = vmatmul.mubr.f32.vlgmr.msra.gmra.mrb[0].mxu1 %v362_v51  ;;  %850 = vmatprep.mubr.f32.mxu0 %v390_v54 }
  0xb0   : > { %888 = vmatprep.mubr.f32.mxu1 %v363_v52 }
  0xb2   : > { %851 = vmatmul.mubr.f32.gmra.mrb[2].mxu0 %v391_v56 }
  0xb3   : > { %889 = vmatmul.mubr.f32.gmra.mrb[2].mxu1 %v364_v55 }
 0x181   : > { %v849_v58 = vpop.f32.mrb[0].mxu0 }
 0x182   : > { %v501_v59 = vmul.f32 %v849_v58, %v766_v57  ;;  %v474_v60 = vpop.f32.mrb[1].mxu0  ;;  %v887_v61 = vpop.f32.mrb[0].mxu1 }
 0x183   : > { %v500_v62 = vmul.f32 %v766_v57, %v474_v60  ;;  %v570_v0 = vpop.f32.mrb[1].mxu1 }
 0x184   : > { %v576_v1 = vadd.f32 %v887_v61, %v501_v59 }
 0x185   : > { %v571_v2 = vadd.f32 %v570_v0, %v500_v62  ;;  %v852_v3 = vpop.f32.mrb[2].mxu0 }
 0x186   : > { %v597_v4 = vadd.f32 %v767_v63, %v576_v1  ;;  %v503_v5 = vmul.f32 %v852_v3, %v766_v57  ;;  %v484_v6 = vpop.f32.mrb[3].mxu0  ;;  %v890_v7 = vpop.f32.mrb[2].mxu1 }
 0x187   : > { %v596_v8 = vadd.f32 %v767_v63, %v571_v2  ;;  %v502_v9 = vmul.f32 %v766_v57, %v484_v6  ;;  %v580_v10 = vpop.f32.mrb[3].mxu1 }
 0x188   : > { %601 = vst [vmem:[%s350_s16 + $0x8] sm:$0xff] %v597_v4  ;;  %v586_v11 = vadd.f32 %v890_v7, %v503_v5 }
 0x189   : > { %600 = vst [vmem:[%s350_s16] sm:$0xff] %v596_v8  ;;  %v581_v12 = vadd.f32 %v580_v10, %v502_v9 }
 0x18a   : > { %v599_v13 = vadd.f32 %v767_v63, %v586_v11 }
 0x18b   : > { %v598_v14 = vadd.f32 %v767_v63, %v581_v12 }
 0x18c   : > { %603 = vst [vmem:[%s350_s16 + $0x18] sm:$0xff] %v599_v13 }
 0x18d   : > { %602 = vst [vmem:[%s350_s16 + $0x10] sm:$0xff] %v598_v14 }
 0x18e   : > { %1141 = shalt.err (!%p1138_p11)
}
 0x18f   : > { %s1142_s9 = scalar_lea.hbm %s1499_s30, 512  ;;  %s1146_s15 = scalar_lea.hbm %s1554_s6, 1024 }
 0x190   : > { %p1143_p0 = scmp.ne.s32.totalorder %s1499_s30, %s1142_s9  ;;  %p1147_p6 = scmp.lt.u32.totalorder %s1499_s30, %s1554_s6 }
 0x191   : > { %p1148_p7 = scmp.lt.u32.totalorder %s1146_s15, %s1142_s9  ;;  %p1150_p8 = scmp.lt.u32.totalorder %s1142_s9, %s1499_s30 }
 0x192   : > { %p1144_p4 = pnand %p1143_p0, %p1573_p12 }
 0x193   : > { %p1149_p2 = por %p1148_p7, %p1147_p6 }
 0x194   : > { %p1145_p13 = pneg %p1144_p4 }
 0x195   : > { %p1151_p1 = por %p1150_p8, %p1149_p2 }
 0x197   : > { %p1152_p10 = pnand %p1151_p1, %p1145_p13 }
 0x199   : > { %1155 = shalt.err (!%p1152_p10)
}
 0x19a   : > { %s1222_s11 = smov 128   ;;  %s1223_s18 = smov 8  }
 0x19b   : > { %965 = dma.vmem_to_hbm [thread:$0]  (%p1573_p12), %s1494_s14, 512, %s1499_s30, %s605_s19, %s1222_s11, %s1222_s11, %s1223_s18  }
 0x19c PF: > { %s1574_s24 = sld [smem:[#allocation12_spill]]  ;;  %s634_s10 = sand.u32 1, %s1194_s21  }
 0x19d   : > { %p1576_p5 = scmp.ge.s32.totalorder %s1214_s26, 2  ;;  %s635_s29 = scalar_lea.sflag [#allocation4], %s634_s10 }
 0x1a2   : > { %p1575_p3 = scmp.ne.s32.totalorder %s1574_s24, 0 }
 0x1a4   : > { %p979_p9 = pnand %p1576_p5, %p1575_p3 }
 0x1a6   : > { %1189 = dma.done.wait (!%p979_p9), %s635_s29, 512  }
 0x1a7   : > { %1191 = vsyncadd (!%p979_p9), %s635_s29, 4294966784  ;;  %s23_s26 = sadd.s32 1, %s1214_s26   ;;  %s1577_s21 = smov %s1198_s22 }
 0x1a8   : > { %p20_p11 = scmp.ge.s32.totalorder %s23_s26, 4   ;;  %s1578_s22 = smov %s1202_s23 }
 0x1a9   : > { %s1579_s23 = smov %s1407_s27  ;;  %s1580_s24 = smov %s1210_s25 }
 0x1aa   : > { %s1581_s25 = smov %s1583_s12  ;;  %22 = sbr.rel (!%p20_p11) target bundleno = 7 (0x7), region = 105 }
 0x1b1   :  { %640 = vsyncpa [#allocation3], 1 }
 0x1b2   :  { %642 = vsyncpa [#allocation3 + $0x1], 1 }
 0x1b3   :  { %643 = vsyncpa [#allocation6], 1 }
 0x1b4   :  { %644 = vsyncpa [#allocation4], 1 }
 0x1b5   :  { %646 = vsyncpa [#allocation4 + $0x1], 1 }

</bundles_post_ra>
